<compile_context>
chip_gen: v7x
topology: tpu7x:2x2x1
jax: 0.10.0
libtpu: 0.0.40
codegen_flags: <defaults>
</compile_context>

<pallas_src>
import jax
import jax.numpy as jnp
from jax.experimental import pallas as pl
from jax.experimental.pallas import tpu as pltpu


def _make_residual_kernel(weight: float, residual: bool):
    w = float(weight)  # compile-time constant; weak-typed so low-precision x keeps dtype
    if residual:
        def kernel(x_ref, o_ref):
            x = x_ref[...]
            o_ref[...] = x + x * w          # y = x + module(x)
    else:
        def kernel(x_ref, o_ref):
            o_ref[...] = x_ref[...] * w     # y = module(x)
    return kernel


# Only force >=2 grid steps (v7x megacore) above this total size.
_MIN_SPLIT_BYTES = 2 * 1024 * 1024


def _default_tile_bytes() -> int:
    """Generation-aware per-tile VMEM target.

    v5e scoped-VMEM default is 16 MiB -> ~2 MiB tiles (4x footprint with
    double-buffered in+out = 8 MiB).  v6e / v7x default to 32 MiB scoped VMEM ->
    4 MiB tiles (16 MiB footprint) amortize the ~0.35 us per-step overhead better.
    """
    try:
        kind = jax.devices()[0].device_kind.lower()
    except Exception:
        kind = ""
    if "v5" in kind:
        return 2 * 1024 * 1024
    return 4 * 1024 * 1024


def _choose_2d_layout(x: jax.Array, sublane: int):
    """Flatten to (rows, cols) with cols a multiple of 128 whenever possible."""
    total = x.size
    if total % 128 == 0:
        fallback = None
        # Search every multiple-of-128 divisor (widest lane-dense cols first),
        # keeping at least one sublane worth of rows so the row axis is tileable.
        for cols in range(8192, 127, -128):
            if total % cols == 0:
                rows = total // cols
                if rows >= sublane:
                    return rows, cols
                if fallback is None:
                    fallback = (rows, cols)
        if fallback is not None:            # tiny lane-dense array
            return fallback
    # Ragged fallback: keep the original trailing dim as the lane axis; rows are
    # still tiled (a (block_rows, cols_full) block is legal for any cols because
    # the last block dim equals the full array dim).
    last = x.shape[-1] if x.ndim >= 1 else 1
    last = max(int(last), 1)
    return total // last, last


def residual_scale(x: jax.Array, weight: float, residual: bool = True,
                   *, target_tile_bytes: int | None = None) -> jax.Array:
    """Pallas forward pass of Residual(scale-by-weight module)."""
    if x.size == 0:
        return x

    orig_shape = x.shape
    itemsize = jnp.dtype(x.dtype).itemsize
    sublane = {4: 8, 2: 16, 1: 32}.get(itemsize, 8)   # dtype-native sublane quantum

    rows, cols = _choose_2d_layout(x, sublane)
    x2d = x.reshape(rows, cols)

    if target_tile_bytes is None:
        target_tile_bytes = _default_tile_bytes()

    row_bytes = cols * itemsize
    # Largest row-tile (multiple of the sublane quantum) under the VMEM target.
    max_rows = max(sublane, (target_tile_bytes // row_bytes) // sublane * sublane)
    block_rows = min(rows, max_rows)

    # Guarantee >= 2 grid steps for large-ish arrays so both v7x TensorCores get
    # work under dimension_semantics=("parallel",); neutral on v5e/v6e (1 TC).
    total_bytes = rows * cols * itemsize
    if total_bytes >= _MIN_SPLIT_BYTES and rows >= 2 * sublane:
        half_rows = -(-rows // 2)
        half_rows = -(-half_rows // sublane) * sublane        # round up to sublane
        block_rows = min(block_rows, half_rows)

    if block_rows != rows:
        # Tiled path: block rows must be a sublane multiple (boundary block masked).
        block_rows = max(sublane, (block_rows // sublane) * sublane)

    grid = (pl.cdiv(rows, block_rows),)

    kernel = _make_residual_kernel(weight, residual)
    flops = (2 if residual else 1) * int(x.size)

    out2d = pl.pallas_call(
        kernel,
        out_shape=jax.ShapeDtypeStruct((rows, cols), x.dtype),
        grid_spec=pl.GridSpec(
            grid=grid,
            in_specs=[pl.BlockSpec((block_rows, cols), lambda i: (i, 0))],
            out_specs=pl.BlockSpec((block_rows, cols), lambda i: (i, 0)),
        ),
        compiler_params=pltpu.CompilerParams(
            dimension_semantics=("parallel",),   # megacore sharding on v7x
        ),
        cost_estimate=pl.CostEstimate(
            flops=flops,
            transcendentals=0,
            bytes_accessed=2 * int(x.size) * itemsize,
        ),
    )(x2d)

    return out2d.reshape(orig_shape)


if __name__ == "__main__":
    key = jax.random.PRNGKey(0)
    weight = 2.5  # static scalar of the wrapped scale module

    def check(x, residual, **kw):
        y = residual_scale(x, weight, residual=residual, **kw)
        jax.block_until_ready(y)
        ref = x + x * weight if residual else x * weight
        assert y.shape == x.shape and y.dtype == x.dtype
        tol = 1e-6 if x.dtype == jnp.float32 else 1e-2
        assert jnp.allclose(y, ref, atol=tol), "mismatch vs reference"

    k1, k2, k3, k4 = jax.random.split(key, 4)

    # 1) Main case: small NCHW activation, lane-dense layout, single full block.
    x1 = jax.random.normal(k1, (2, 4, 16, 16), dtype=jnp.float32)
    check(x1, residual=True)
    check(x1, residual=False)   # residual=False branch: forward returns module(x)

    # 2) Lane-dense layout with multiple grid steps and a masked boundary block
    #    (small target_tile_bytes forces the tiled path at small test shapes).
    x2 = jax.random.normal(k2, (100, 384), dtype=jnp.float32)
    check(x2, residual=True, target_tile_bytes=16 * 1024)

    # 3) Ragged size (not a multiple of 128): non-lane-dense fallback, still tiled
    #    along rows with a masked boundary block.
    x3 = jax.random.normal(k3, (30, 7), dtype=jnp.float32)
    check(x3, residual=True, target_tile_bytes=512)

    # 4) bf16 input (16-row sublane quantum).
    x4 = jax.random.normal(k4, (2, 4, 16, 16), dtype=jnp.bfloat16)
    check(x4, residual=True)

    print("KERNEL_OK")
</pallas_src>

<mosaic_0001>
module attributes {stable_mosaic.version = 11 : i64} {
  func.func @kernel(%arg0: i32, %arg1: memref<8x256xf32, #tpu.memory_space<vmem>>, %arg2: memref<8x256xf32, #tpu.memory_space<vmem>>) attributes {dimension_semantics = [#tpu.dimension_semantics<parallel>], iteration_bounds = array<i64: 1>, scalar_prefetch = 0 : i64, scratch_operands = 0 : i64, tpu.core_type = #tpu.core_type<tc>, window_params = [{transform_indices = @transform_0, window_bounds = array<i64: 8, 256>}, {transform_indices = @transform_1, window_bounds = array<i64: 8, 256>}]} {
    %c0 = arith.constant 0 : index
    %c0_0 = arith.constant 0 : index
    %0 = vector.load %arg1[%c0, %c0_0] : memref<8x256xf32, #tpu.memory_space<vmem>>, vector<8x256xf32>
    %cst = arith.constant 2.500000e+00 : f32
    %1 = vector.broadcast %cst : f32 to vector<8x256xf32>
    %2 = arith.mulf %0, %1 : vector<8x256xf32>
    %3 = arith.addf %0, %2 : vector<8x256xf32>
    %c0_1 = arith.constant 0 : index
    %c0_2 = arith.constant 0 : index
    %4 = vector.load %arg2[%c0_1, %c0_2] : memref<8x256xf32, #tpu.memory_space<vmem>>, vector<8x256xf32>
    tpu.vector_store %arg2[%c0_1, %c0_2], %3 {strides = array<i32>} : memref<8x256xf32, #tpu.memory_space<vmem>>, vector<8x256xf32>,
    return
  }
  func.func @transform_0(%arg0: i32) -> (i32, i32) {
    %c0_i32 = arith.constant 0 : i32
    %c0_i32_0 = arith.constant 0 : i32
    return %arg0, %c0_i32 : i32, i32
  }
  func.func @transform_1(%arg0: i32) -> (i32, i32) {
    %c0_i32 = arith.constant 0 : i32
    %c0_i32_0 = arith.constant 0 : i32
    return %arg0, %c0_i32 : i32, i32
  }
}

</mosaic_0001>

<bundles_post_ra>
// kernel: tpu_custom_call.1
= control target key start
LH: loop header
LB: loop body
LE: loop exit
PB: predicated region body
PF: predicated region fallthrough
CT: control target
= control target key end

     0   :  { %6 = vsyncpa [#allocation3], 0  ;;  %s130_s0 = inlined_call_operand.hbm [shape: f32[8,256], index: 0, kind: input, shape index: {}]   ;;  %s131_s1 = inlined_call_operand.hbm [shape: f32[8,256], index: 1, kind: output, shape index: {}]  }
   0x1   :  { %7 = vsyncpa [#allocation4], 0  ;;  %s94_s6 = smov [#allocation2]   ;;  %s46_s10 = scalar_lea.hbm %s130_s0, 256 }
   0x2   :  { %s14_s7 = sshll.u32 %s94_s6, 4  ;;  %p47_p0 = scmp.ne.s32.totalorder %s130_s0, %s46_s10  ;;  %s15_s7 = int_to_ptr.vmem [resolvable:$true] %s14_s7 }
   0x3   :  { %p50_p1 = scmp.lt.u32.totalorder %s46_s10, %s130_s0 }
   0x5   :  { %p52_p2 = pnand %p50_p1, %p47_p0 }
   0x7   :  { %55 = shalt.err (!%p52_p2)
}
   0x8   :  { %s56_s15 = scalar_lea.vmem %s15_s7, 256  ;;  %p61_p4 = scmp.lt.s32.totalorder %s15_s7, %s15_s7 }
   0x9   :  { %p57_p3 = scmp.ne.s32.totalorder %s15_s7, %s56_s15  ;;  %p62_p5 = scmp.lt.s32.totalorder %s56_s15, %s56_s15 }
   0xb   :  { %p63_p6 = por %p62_p5, %p61_p4 }
   0xd   :  { %p64_p7 = pnand %p63_p6, %p57_p3 }
   0xf   :  { %67 = shalt.err (!%p64_p7)
}
  0x10   :  { %17 = dma.hbm_to_vmem [thread:$0]  %s130_s0, 256, %s15_s7, [#allocation3]  }
  0x11   :  { %90 = dma.done.wait [#allocation3], 256  }
  0x12   :  { %91 = vsyncadd [#allocation3], 4294967040  ;;  %v21_v0 = vld [vmem:[#allocation2] sm:$0xff]  ;;  %v22_v1 = vld [vmem:[#allocation2 + $0x8] sm:$0xff]  ;;  %s95_s18 = smov [#allocation5]  }
  0x13   :  { %s35_s19 = sshll.u32 %s95_s18, 4  ;;  %v23_v2 = vmul.f32 2.5, %v21_v0  ;;  %v24_v3 = vmul.f32 2.5, %v22_v1  ;;  %s36_s19 = int_to_ptr.vmem [resolvable:$true] %s35_s19 }
  0x14   :  { %s68_s20 = scalar_lea.vmem %s36_s19, 256  ;;  %p73_p9 = scmp.lt.s32.totalorder %s36_s19, %s36_s19 }
  0x15   :  { %v25_v4 = vadd.f32 %v23_v2, %v21_v0  ;;  %v26_v5 = vadd.f32 %v24_v3, %v22_v1  ;;  %p69_p8 = scmp.ne.s32.totalorder %s36_s19, %s68_s20  ;;  %p74_p10 = scmp.lt.s32.totalorder %s68_s20, %s68_s20 }
  0x17   :  { %27 = vst [vmem:[#allocation5] sm:$0xff] %v25_v4  ;;  %28 = vst [vmem:[#allocation5 + $0x8] sm:$0xff] %v26_v5  ;;  %p75_p11 = por %p74_p10, %p73_p9 }
  0x19   :  { %p76_p12 = pnand %p75_p11, %p69_p8 }
  0x1b   :  { %79 = shalt.err (!%p76_p12)
}
  0x1c   :  { %s80_s22 = scalar_lea.hbm %s131_s1, 256 }
  0x1d   :  { %p81_p13 = scmp.ne.s32.totalorder %s131_s1, %s80_s22  ;;  %p84_p0 = scmp.lt.u32.totalorder %s80_s22, %s131_s1 }
  0x1f   :  { %p86_p1 = pnand %p84_p0, %p81_p13 }
  0x21   :  { %89 = shalt.err (!%p86_p1)
}
  0x22   :  { %38 = dma.vmem_to_hbm [thread:$0]  %s36_s19, 256, %s131_s1, [#allocation4]  }
  0x23   :  { %92 = dma.done.wait [#allocation4], 256  }
  0x24   :  { %93 = vsyncadd [#allocation4], 4294967040 }
  0x25   :  { %42 = vsyncpa [#allocation3], 1 }
  0x26   :  { %43 = vsyncpa [#allocation4], 1 }

</bundles_post_ra>
